<compile_context>
chip_gen: v7x
topology: tpu7x:2x2x1
jax: 0.10.0
libtpu: 0.0.40
codegen_flags: <defaults>
</compile_context>

<pallas_src>
import functools

import jax
import jax.numpy as jnp
from jax import lax
from jax.experimental import pallas as pl
from jax.experimental.pallas import tpu as pltpu


def _mmd_rbf_kernel(inv_bw_ref, row_ref, col_ref, out_ref, acc_ref, *,
                    batch_size, row_tile, col_tile, kernel_mul, kernel_num):
    i = pl.program_id(0)          # row-tile index of the (N, N) kernel matrix
    j = pl.program_id(1)          # col-tile index

    @pl.when(jnp.logical_and(i == 0, j == 0))
    def _init():
        acc_ref[...] = jnp.zeros_like(acc_ref)

    x = row_ref[...]              # (tr, D)
    y = col_ref[...]              # (tc, D)

    # Gram tile directly in NT form (MXU); f32 accumulation regardless of the
    # input dtype, no transposed copy of y is ever materialized.
    gram = lax.dot_general(
        x, y, dimension_numbers=(((1,), (1,)), ((), ())),
        preferred_element_type=jnp.float32)            # (tr, tc)

    xf = x.astype(jnp.float32)
    yf = y.astype(jnp.float32)
    xn = jnp.sum(xf * xf, axis=1, keepdims=True)       # (tr, 1)
    yn = jnp.sum(yf * yf, axis=1, keepdims=True)       # (tc, 1)
    # ||xi - yj||^2 ; clamp: FP cancellation in the Gram form can go slightly
    # negative, which would make exp(-l2/bw) exceed 1.
    l2 = jnp.maximum(xn + yn.T - 2.0 * gram, 0.0)      # (tr, tc)

    # Multi-bandwidth RBF sum.  bandwidth_list[t] = bw * kernel_mul**t, so
    #   exp(-l2 / (bw * mul**t)) = exp(-l2 / bw) ** (mul**-t)
    # For kernel_mul == 2 this is 1 exp + (kernel_num-1) sqrts instead of
    # kernel_num exps.  All scalings are reciprocal-multiplies (no vector divide).
    inv_bw = inv_bw_ref[0, 0]                          # f32 scalar from SMEM
    e = jnp.exp(l2 * (-inv_bw))                        # narrowest bandwidth (t=0)
    ksum = e
    if float(kernel_mul) == 2.0:
        for _ in range(1, kernel_num):
            e = jnp.sqrt(e)
            ksum = ksum + e
    else:
        for t in range(1, kernel_num):
            scale = jnp.float32(-1.0 / (float(kernel_mul) ** t))
            ksum = ksum + jnp.exp(l2 * (scale * inv_bw))

    # One signed reduction replaces the four masked block means:
    # sign = +1 on the XX / YY quadrants, -1 on XY / YX.
    row_idx = i * row_tile + lax.broadcasted_iota(
        jnp.int32, (row_tile, col_tile), 0)
    col_idx = j * col_tile + lax.broadcasted_iota(
        jnp.int32, (row_tile, col_tile), 1)
    same_side = (row_idx < batch_size) == (col_idx < batch_size)
    sign = jnp.where(same_side, jnp.float32(1.0), jnp.float32(-1.0))

    acc_ref[...] = acc_ref[...] + jnp.sum(ksum * sign)

    last = jnp.logical_and(i == pl.num_programs(0) - 1,
                           j == pl.num_programs(1) - 1)

    @pl.when(last)
    def _finalize():
        inv_bb = jnp.float32(1.0 / float(batch_size * batch_size))
        out_ref[...] = acc_ref[...] * inv_bb


def _pick_tile(n, target):
    """Largest multiple-of-8 divisor of n that is <= target (else n itself)."""
    if n <= target:
        return n
    t = (target // 8) * 8
    while t >= 8:
        if n % t == 0:
            return t
        t -= 8
    return n


def mmd_rbf(source, target, *, kernel_mul=2.0, kernel_num=5, tile=256):
    """Pallas TPU implementation of MMD.forward with kernel_type='rbf'."""
    assert source.shape == target.shape and source.ndim == 2
    B, D = source.shape
    n = 2 * B

    # Concatenate once in the wrapper (avoids an in-kernel (2B, D) VMEM copy).
    total = jnp.concatenate([source, target], axis=0)

    # Closed-form bandwidth (O(N*D) prep, not the hot path):
    #   sum_ij ||xi - xj||^2 = 2*N*sum_i ||xi||^2 - 2*||sum_i xi||^2
    tf32 = total.astype(jnp.float32)
    sum_sq = jnp.sum(tf32 * tf32)
    col_sum = jnp.sum(tf32, axis=0)
    sum_l2 = 2.0 * n * sum_sq - 2.0 * jnp.dot(col_sum, col_sum)
    bandwidth = sum_l2 / float(n * n - n)
    bandwidth = bandwidth / (float(kernel_mul) ** (kernel_num // 2))
    inv_bw = (1.0 / bandwidth).astype(jnp.float32).reshape(1, 1)

    tr = _pick_tile(n, tile)
    tc = tr
    grid = (n // tr, n // tc)

    kernel = functools.partial(
        _mmd_rbf_kernel,
        batch_size=B, row_tile=tr, col_tile=tc,
        kernel_mul=float(kernel_mul), kernel_num=int(kernel_num))

    out = pl.pallas_call(
        kernel,
        out_shape=jax.ShapeDtypeStruct((1, 1), jnp.float32),
        grid=grid,
        in_specs=[
            pl.BlockSpec(memory_space=pltpu.MemorySpace.SMEM),   # 1/bandwidth
            pl.BlockSpec((tr, D), lambda i, j: (i, 0)),          # row tile of total
            pl.BlockSpec((tc, D), lambda i, j: (j, 0)),          # col tile of total
        ],
        out_specs=pl.BlockSpec((1, 1), lambda i, j: (0, 0)),
        scratch_shapes=[pltpu.VMEM((1, 1), jnp.float32)],
        compiler_params=pltpu.CompilerParams(
            # A single shared scalar accumulator => both axes stay sequential.
            # TODO(synk): for v7x megacore, emit per-row-tile partial sums and
            # mark the row axis "parallel" to use both TensorCores.
            dimension_semantics=("arbitrary", "arbitrary"),
            vmem_limit_bytes=48 * 1024 * 1024),
    )(inv_bw, total, total)
    return out[0, 0]


def _mmd_rbf_ref(source, target, kernel_mul=2.0, kernel_num=5):
    """Pure-JAX reference mirroring the PyTorch module (for verification)."""
    total = jnp.concatenate([source, target], axis=0).astype(jnp.float32)
    n = total.shape[0]
    diff = total[None, :, :] - total[:, None, :]
    l2 = jnp.sum(diff * diff, axis=2)
    bandwidth = jnp.sum(l2) / (n * n - n)
    bandwidth = bandwidth / (kernel_mul ** (kernel_num // 2))
    kern = sum(jnp.exp(-l2 / (bandwidth * kernel_mul ** i))
               for i in range(kernel_num))
    b = source.shape[0]
    xx = jnp.mean(kern[:b, :b])
    yy = jnp.mean(kern[b:, b:])
    xy = jnp.mean(kern[:b, b:])
    yx = jnp.mean(kern[b:, :b])
    return xx + yy - xy - yx


if __name__ == "__main__":
    key = jax.random.PRNGKey(0)
    k1, k2 = jax.random.split(key)

    # Small shape consistent with the module's forward (single-tile path).
    B, D = 8, 32
    source = jax.random.normal(k1, (B, D), dtype=jnp.float32)
    target = jax.random.normal(k2, (B, D), dtype=jnp.float32) + 0.5
    loss = mmd_rbf(source, target)
    jax.block_until_ready(loss)
    ref = _mmd_rbf_ref(source, target)
    assert jnp.allclose(loss, ref, rtol=1e-3, atol=1e-4), (loss, ref)

    # Slightly larger shape exercising the 2-D tiled accumulator path (grid 2x2).
    B2, D2 = 64, 128
    k3, k4 = jax.random.split(k2)
    source2 = jax.random.normal(k3, (B2, D2), dtype=jnp.float32)
    target2 = jax.random.normal(k4, (B2, D2), dtype=jnp.float32) + 0.5
    loss2 = mmd_rbf(source2, target2, tile=64)
    jax.block_until_ready(loss2)
    ref2 = _mmd_rbf_ref(source2, target2)
    assert jnp.allclose(loss2, ref2, rtol=1e-3, atol=1e-4), (loss2, ref2)

    print("KERNEL_OK")
</pallas_src>

<mosaic_0001>
module attributes {stable_mosaic.version = 11 : i64} {
  func.func @_mmd_rbf_kernel(%arg0: i32, %arg1: i32, %arg2: memref<1x1xf32, #tpu.memory_space<smem>>, %arg3: memref<16x32xf32, #tpu.memory_space<vmem>>, %arg4: memref<16x32xf32, #tpu.memory_space<vmem>>, %arg5: memref<1x1xf32, #tpu.memory_space<vmem>>, %arg6: memref<1x1xf32, #tpu.memory_space<vmem>>) attributes {dimension_semantics = [#tpu.dimension_semantics<arbitrary>, #tpu.dimension_semantics<arbitrary>], iteration_bounds = array<i64: 1, 1>, scalar_prefetch = 0 : i64, scratch_operands = 1 : i64, tpu.core_type = #tpu.core_type<tc>, window_params = [{transform_indices = @transform_0, window_bounds = array<i64: 1, 1>}, {transform_indices = @transform_1, window_bounds = array<i64: 16, 32>}, {transform_indices = @transform_2, window_bounds = array<i64: 16, 32>}, {pipeline_mode = #tpu.pipeline_mode<synchronous>, transform_indices = @transform_3, window_bounds = array<i64: 1, 1>}]} {
    %c0_i32 = arith.constant 0 : i32
    %0 = arith.cmpi eq, %arg0, %c0_i32 : i32
    %c0_i32_0 = arith.constant 0 : i32
    %1 = arith.cmpi eq, %arg1, %c0_i32_0 : i32
    %2 = arith.andi %0, %1 : i1
    %3 = arith.extui %2 : i1 to i32
    %c0_i32_1 = arith.constant 0 : i32
    %4 = arith.cmpi ne, %3, %c0_i32_1 : i32
    scf.if %4 {
      %cst_25 = arith.constant 0.000000e+00 : f32
      %67 = vector.broadcast %cst_25 : f32 to vector<1x1xf32>
      %c0_26 = arith.constant 0 : index
      %c0_27 = arith.constant 0 : index
      %68 = vector.load %arg6[%c0_26, %c0_27] : memref<1x1xf32, #tpu.memory_space<vmem>>, vector<1x1xf32>
      tpu.vector_store %arg6[%c0_26, %c0_27], %67 {strides = array<i32>} : memref<1x1xf32, #tpu.memory_space<vmem>>, vector<1x1xf32>,
    } else {
    }
    %c0 = arith.constant 0 : index
    %c0_2 = arith.constant 0 : index
    %5 = vector.load %arg3[%c0, %c0_2] : memref<16x32xf32, #tpu.memory_space<vmem>>, vector<16x32xf32>
    %c0_3 = arith.constant 0 : index
    %c0_4 = arith.constant 0 : index
    %6 = vector.load %arg4[%c0_3, %c0_4] : memref<16x32xf32, #tpu.memory_space<vmem>>, vector<16x32xf32>
    %cst = arith.constant dense<0.000000e+00> : vector<16x16xf32>
    %7 = tpu.matmul %5, %6, %cst {dimension_numbers = #tpu.dot_dimension_numbers<[1], [1], [0], [0], [0, 0, 1, 0], [], []>} : vector<16x32xf32>, vector<16x32xf32>, vector<16x16xf32> -> vector<16x16xf32>
    %8 = arith.mulf %5, %5 : vector<16x32xf32>
    %cst_5 = arith.constant dense<0.000000e+00> : vector<16xf32>
    %9 = vector.multi_reduction <add>, %8, %cst_5 [1] : vector<16x32xf32> to vector<16xf32>
    %10 = vector.shape_cast %9 : vector<16xf32> to vector<16x1xf32>
    %11 = arith.mulf %6, %6 : vector<16x32xf32>
    %cst_6 = arith.constant dense<0.000000e+00> : vector<16xf32>
    %12 = vector.multi_reduction <add>, %11, %cst_6 [1] : vector<16x32xf32> to vector<16xf32>
    %13 = vector.shape_cast %12 : vector<16xf32> to vector<16x1xf32>
    %14 = tpu.transpose %13, [1, 0] : vector<16x1xf32> -> vector<1x16xf32>
    %15 = vector.broadcast %10 : vector<16x1xf32> to vector<16x16xf32>
    %16 = vector.broadcast %14 : vector<1x16xf32> to vector<16x16xf32>
    %17 = arith.addf %15, %16 : vector<16x16xf32>
    %cst_7 = arith.constant 2.000000e+00 : f32
    %18 = vector.broadcast %cst_7 : f32 to vector<16x16xf32>
    %19 = arith.mulf %18, %7 : vector<16x16xf32>
    %20 = arith.subf %17, %19 : vector<16x16xf32>
    %cst_8 = arith.constant 0.000000e+00 : f32
    %21 = vector.broadcast %cst_8 : f32 to vector<16x16xf32>
    %22 = arith.maximumf %20, %21 : vector<16x16xf32>
    %c0_9 = arith.constant 0 : index
    %c0_10 = arith.constant 0 : index
    %23 = memref.load %arg2[%c0_9, %c0_10] : memref<1x1xf32, #tpu.memory_space<smem>>
    %cst_11 = arith.constant 0.000000e+00 : f32
    %24 = arith.subf %cst_11, %23 : f32
    %25 = vector.broadcast %24 : f32 to vector<16x16xf32>
    %26 = arith.mulf %22, %25 : vector<16x16xf32>
    %27 = math.exp %26 : vector<16x16xf32>
    %28 = math.sqrt %27 : vector<16x16xf32>
    %29 = arith.addf %27, %28 : vector<16x16xf32>
    %30 = math.sqrt %28 : vector<16x16xf32>
    %31 = arith.addf %29, %30 : vector<16x16xf32>
    %32 = math.sqrt %30 : vector<16x16xf32>
    %33 = arith.addf %31, %32 : vector<16x16xf32>
    %34 = math.sqrt %32 : vector<16x16xf32>
    %35 = arith.addf %33, %34 : vector<16x16xf32>
    %c16_i32 = arith.constant 16 : i32
    %36 = arith.muli %arg0, %c16_i32 : i32
    %37 = tpu.iota {dimensions = array<i32: 0>} : vector<16x16xi32>
    %38 = vector.broadcast %36 : i32 to vector<16x16xi32>
    %39 = arith.addi %38, %37 : vector<16x16xi32>
    %c16_i32_12 = arith.constant 16 : i32
    %40 = arith.muli %arg1, %c16_i32_12 : i32
    %41 = tpu.iota {dimensions = array<i32: 1>} : vector<16x16xi32>
    %42 = vector.broadcast %40 : i32 to vector<16x16xi32>
    %43 = arith.addi %42, %41 : vector<16x16xi32>
    %c8_i32 = arith.constant 8 : i32
    %44 = vector.broadcast %c8_i32 : i32 to vector<16x16xi32>
    %45 = arith.cmpi slt, %39, %44 : vector<16x16xi32>
    %c8_i32_13 = arith.constant 8 : i32
    %46 = vector.broadcast %c8_i32_13 : i32 to vector<16x16xi32>
    %47 = arith.cmpi slt, %43, %46 : vector<16x16xi32>
    %48 = arith.xori %45, %47 : vector<16x16xi1>
    %cst_14 = arith.constant dense<true> : vector<16x16xi1>
    %49 = arith.xori %48, %cst_14 : vector<16x16xi1>
    %cst_15 = arith.constant 1.000000e+00 : f32
    %cst_16 = arith.constant -1.000000e+00 : f32
    %50 = vector.broadcast %cst_15 : f32 to vector<16x16xf32>
    %51 = vector.broadcast %cst_16 : f32 to vector<16x16xf32>
    %52 = arith.select %49, %50, %51 : vector<16x16xi1>, vector<16x16xf32>
    %c0_17 = arith.constant 0 : index
    %c0_18 = arith.constant 0 : index
    %53 = vector.load %arg6[%c0_17, %c0_18] : memref<1x1xf32, #tpu.memory_space<vmem>>, vector<1x1xf32>
    %54 = arith.mulf %35, %52 : vector<16x16xf32>
    %55 = vector.shape_cast %54 : vector<16x16xf32> to vector<1x16x16xf32>
    %cst_19 = arith.constant dense<0.000000e+00> : vector<1xf32>
    %56 = vector.multi_reduction <add>, %55, %cst_19 [1, 2] : vector<1x16x16xf32> to vector<1xf32>
    %57 = vector.shape_cast %56 : vector<1xf32> to vector<1x1x1xf32>
    %58 = vector.extract %57[0, 0, 0] : f32 from vector<1x1x1xf32>
    %59 = vector.broadcast %58 : f32 to vector<1x1xf32>
    %60 = arith.addf %53, %59 : vector<1x1xf32>
    %c0_20 = arith.constant 0 : index
    %c0_21 = arith.constant 0 : index
    %61 = vector.load %arg6[%c0_20, %c0_21] : memref<1x1xf32, #tpu.memory_space<vmem>>, vector<1x1xf32>
    tpu.vector_store %arg6[%c0_20, %c0_21], %60 {strides = array<i32>} : memref<1x1xf32, #tpu.memory_space<vmem>>, vector<1x1xf32>,
    %c0_i32_22 = arith.constant 0 : i32
    %62 = arith.cmpi eq, %arg0, %c0_i32_22 : i32
    %c0_i32_23 = arith.constant 0 : i32
    %63 = arith.cmpi eq, %arg1, %c0_i32_23 : i32
    %64 = arith.andi %62, %63 : i1
    %65 = arith.extui %64 : i1 to i32
    %c0_i32_24 = arith.constant 0 : i32
    %66 = arith.cmpi ne, %65, %c0_i32_24 : i32
    scf.if %66 {
      %c0_25 = arith.constant 0 : index
      %c0_26 = arith.constant 0 : index
      %67 = vector.load %arg6[%c0_25, %c0_26] : memref<1x1xf32, #tpu.memory_space<vmem>>, vector<1x1xf32>
      %cst_27 = arith.constant 1.562500e-02 : f32
      %68 = vector.broadcast %cst_27 : f32 to vector<1x1xf32>
      %69 = arith.mulf %67, %68 : vector<1x1xf32>
      %c0_28 = arith.constant 0 : index
      %c0_29 = arith.constant 0 : index
      %70 = vector.load %arg5[%c0_28, %c0_29] : memref<1x1xf32, #tpu.memory_space<vmem>>, vector<1x1xf32>
      tpu.vector_store %arg5[%c0_28, %c0_29], %69 {strides = array<i32>} : memref<1x1xf32, #tpu.memory_space<vmem>>, vector<1x1xf32>,
    } else {
    }
    return
  }
  func.func @transform_0(%arg0: i32, %arg1: i32) -> (i32, i32) {
    %c0_i32 = arith.constant 0 : i32
    %c0_i32_0 = arith.constant 0 : i32
    %c0_i32_1 = arith.constant 0 : i32
    return %c0_i32, %c0_i32_0 : i32, i32
  }
  func.func @transform_1(%arg0: i32, %arg1: i32) -> (i32, i32) {
    %c0_i32 = arith.constant 0 : i32
    %c0_i32_0 = arith.constant 0 : i32
    return %arg0, %c0_i32 : i32, i32
  }
  func.func @transform_2(%arg0: i32, %arg1: i32) -> (i32, i32) {
    %c0_i32 = arith.constant 0 : i32
    %c0_i32_0 = arith.constant 0 : i32
    return %arg1, %c0_i32 : i32, i32
  }
  func.func @transform_3(%arg0: i32, %arg1: i32) -> (i32, i32) {
    %c0_i32 = arith.constant 0 : i32
    %c0_i32_0 = arith.constant 0 : i32
    %c0_i32_1 = arith.constant 0 : i32
    return %c0_i32, %c0_i32_0 : i32, i32
  }
}

</mosaic_0001>

<bundles_post_ra>
// kernel: tpu_custom_call.1
= control target key start
LH: loop header
LB: loop body
LE: loop exit
PB: predicated region body
PF: predicated region fallthrough
CT: control target
= control target key end

     0   :  { %9 = vsyncpa [#allocation5], 0  ;;  %s542_s0 = inlined_call_operand.<no memory space> [shape: f32[1,1], index: 0, kind: input, shape index: {}]   ;;  %s543_s1 = inlined_call_operand.hbm [shape: f32[16,32], index: 1, kind: input, shape index: {}]   ;;  %s544_s2 = inlined_call_operand.hbm [shape: f32[16,32], index: 2, kind: input, shape index: {}]   ;;  %s545_s3 = inlined_call_operand.hbm [shape: f32[1,1], index: 3, kind: output, shape index: {}]  }
   0x1   :  { %10 = vsyncpa [#allocation8], 0 }
   0x2   :  { %11 = vsyncpa [#allocation6], 0  ;;  %s462_s12 = smov [#allocation4]   ;;  %s390_s16 = scalar_lea.hbm %s543_s1, 256 }
   0x3   :  { %s19_s13 = sshll.u32 %s462_s12, 4  ;;  %p391_p0 = scmp.ne.s32.totalorder %s543_s1, %s390_s16  ;;  %s20_s13 = int_to_ptr.vmem [resolvable:$true] %s19_s13 }
   0x4   :  { %p394_p1 = scmp.lt.u32.totalorder %s390_s16, %s543_s1 }
   0x6   :  { %p396_p2 = pnand %p394_p1, %p391_p0 }
   0x8   :  { %399 = shalt.err (!%p396_p2)
}
   0x9   :  { %s400_s21 = scalar_lea.vmem %s20_s13, 256  ;;  %p405_p4 = scmp.lt.s32.totalorder %s20_s13, %s20_s13 }
   0xa   :  { %p401_p3 = scmp.ne.s32.totalorder %s20_s13, %s400_s21  ;;  %p406_p5 = scmp.lt.s32.totalorder %s400_s21, %s400_s21 }
   0xc   :  { %p407_p6 = por %p406_p5, %p405_p4 }
   0xe   :  { %p408_p7 = pnand %p407_p6, %p401_p3 }
  0x10   :  { %411 = shalt.err (!%p408_p7)
}
  0x11   :  { %s463_s22 = smov 128   ;;  %s464_s23 = smov 8  }
  0x12   :  { %25 = dma.hbm_to_vmem [thread:$0]  %s543_s1, 256, %s20_s13, [#allocation5], %s463_s22, %s463_s22, %s464_s23  }
  0x13   :  { %s465_s26 = smov [#allocation7]   ;;  %s412_s30 = scalar_lea.hbm %s544_s2, 256 }
  0x14   :  { %s31_s27 = sshll.u32 %s465_s26, 4  ;;  %p413_p8 = scmp.ne.s32.totalorder %s544_s2, %s412_s30  ;;  %s32_s27 = int_to_ptr.vmem [resolvable:$true] %s31_s27 }
  0x15   :  { %p416_p9 = scmp.lt.u32.totalorder %s412_s30, %s544_s2 }
  0x17   :  { %p418_p10 = pnand %p416_p9, %p413_p8 }
  0x19   :  { %421 = shalt.err (!%p418_p10)
}
  0x1a   :  { %s422_s8 = scalar_lea.vmem %s32_s27, 256  ;;  %p427_p12 = scmp.lt.s32.totalorder %s32_s27, %s32_s27 }
  0x1b   :  { %p423_p11 = scmp.ne.s32.totalorder %s32_s27, %s422_s8  ;;  %p428_p13 = scmp.lt.s32.totalorder %s422_s8, %s422_s8 }
  0x1d   :  { %p429_p0 = por %p428_p13, %p427_p12 }
  0x1f   :  { %p430_p1 = pnand %p429_p0, %p423_p11 }
  0x21   :  { %433 = shalt.err (!%p430_p1)
}
  0x22   :  { %37 = dma.hbm_to_vmem [thread:$0]  %s544_s2, 256, %s32_s27, [#allocation8], %s463_s22, %s463_s22, %s464_s23  }
  0x23   :  { %456 = dma.done.wait [#allocation5], 256  }
  0x24   :  { %457 = vsyncadd [#allocation5], 4294967040 }
  0x25   :  { %458 = dma.done.wait [#allocation8], 256  }
  0x26   :  { %459 = vsyncadd [#allocation8], 4294967040  ;;  %vm56_vm0 = vcmask 261120   ;;  %v54_v0 = vld [vmem:[#allocation7] sm:$0xff]  ;;  %v55_v1 = vld [vmem:[#allocation7 + $0x8] sm:$0xff]  ;;  %v192_v17 = vlaneseq  ;;  %s205_s11 = ssub.f32 0.0, %s542_s0 }
  0x27   :  { %vm355_vm1 = vmpackc.low %vm56_vm0, %vm56_vm0  ;;  %v52_v2 = vld [vmem:[#allocation4] sm:$0xff]  ;;  %v152_v3 = vmul.f32 %v54_v0, %v54_v0  ;;  %v153_v4 = vmul.f32 %v55_v1, %v55_v1  ;;  %v354_v5 = vpack.c.bf16 %v55_v1, %v54_v0  ;;  %v53_v7 = vld [vmem:[#allocation4 + $0x8] sm:$0xff]  ;;  %vm466_vm15 = vmmov 1   ;;  %s469_s12 = smov [#allocation9]  }
  0x28   :  { %351 = vmatprep.mubr.msk.f32.mxu0 %vm56_vm0, %v52_v2  ;;  %v144_v6 = vmul.f32 %v52_v2, %v52_v2  ;;  %v145_v8 = vmul.f32 %v53_v7, %v53_v7  ;;  %v193_v18 = vshrl.u32 %v192_v17, 7  ;;  %v206_v30 = vstv %s205_s11  ;;  %s329_s13 = sshll.u32 %s469_s12, 4  ;;  %s330_s13 = int_to_ptr.vmem [resolvable:$true] %s329_s13 }
  0x29   :  { %v154_v9 = vsel %vm56_vm0, %v152_v3, 0.0  ;;  %356 = vmatprep.subr.msk.bf16.mxu0 %vm355_vm1, %v354_v5  ;;  %v157_v11 = vsel %vm56_vm0, %v153_v4, 0.0  ;;  %s434_s14 = scalar_lea.vmem %s330_s13, 16  ;;  %s438_s15 = scalar_lea.vmem %s330_s13, 32 }
  0x2a   :  { %v146_v10 = vsel %vm56_vm0, %v144_v6, 0.0  ;;  %155 = vadd.xlane.f32.xlu0 %v154_v9  ;;  %359 = vmatpush3.bf16.xpose.msk.msra.mxu0 %vm355_vm1, %v354_v5  ;;  %v149_v12 = vsel %vm56_vm0, %v145_v8, 0.0  ;;  %v194_v20 = vsub.s32 0, %v193_v18  ;;  %p435_p2 = scmp.ne.s32.totalorder %s330_s13, %s434_s14  ;;  %p439_p3 = scmp.lt.s32.totalorder %s330_s13, %s330_s13 }
  0x2b   :  { %147 = vadd.xlane.f32.xlu1 %v146_v10  ;;  %v286_v10 = vand.u32 127, %v192_v17  ;;  %v467_v17 = vmov -1.0   ;;  %p440_p4 = scmp.lt.s32.totalorder %s438_s15, %s434_s14 }
  0x2d   :  { %vm291_vm14 = vcmp.lt.s32.totalorder %v286_v10, 8  ;;  %p441_p5 = por %p440_p4, %p439_p3 }
  0x2e   :  { %158 = vadd.xlane.f32.xlu0 %v157_v11 }
  0x2f   :  { %150 = vadd.xlane.f32.xlu1 %v149_v12  ;;  %p442_p6 = pnand %p441_p5, %p435_p2 }
  0x31   :  { %352 = vmatmul.mubr.msk.f32.vlgmr.msra.gmra.mrb[0].mxu0 %vm56_vm0, %v53_v7  ;;  %vm292_vm0 = vmxor %vm466_vm15, %vm291_vm14 }
  0x32   :  { %vm294_vm1 = vmxor %vm292_vm0, %vm466_vm15 }
  0xb7   :  { %v156_v13 = vpop.xlane.xlu0 %155 }
  0xb8   :  { %160 = vxpose.xlu0.b32.start [1/2] (short) (narrow) %v156_v13, 8  ;;  %v148_v19 = vpop.xlane.xlu1 %147 }
  0xbb   :  { %v159_v14 = vpop.xlane.xlu0 %158 }
  0xbc   :  { %161 = vxpose.xlu0.b32.end [2/2] (short) (narrow) %v159_v14, 8  ;;  %v151_v22 = vpop.xlane.xlu1 %150 }
 0x104   :  { %v353_v15 = vpop.f32.mrb[0].mxu0 }
 0x105   :  { %v135_v16 = vpop.f32.mrb[1].mxu0  ;;  %v199_v24 = vmul.f32 2.0, %v353_v15 }
 0x106   :  { %v198_v25 = vmul.f32 2.0, %v135_v16 }
 0x138   :  { %v176_v21 = vpop.trf.xlu0 }
 0x139   :  { %v195_v23 = vrot.slane %v176_v21, %v194_v20 }
 0x13b   :  { %v196_v26 = vadd.f32 %v195_v23, %v148_v19  ;;  %v197_v27 = vadd.f32 %v195_v23, %v151_v22  ;;  %v296_v22 = vsel %vm294_vm1, 1.0, %v467_v17 }
 0x13d   :  { %v200_v28 = vsub.f32 %v196_v26, %v198_v25  ;;  %v201_v29 = vsub.f32 %v197_v27, %v199_v24 }
 0x13f   :  { %v202_v31 = vmax.f32 %v200_v28, 0.0  ;;  %v203_v32 = vmax.f32 %v201_v29, 0.0 }
 0x141   :  { %v207_v33 = vmul.f32 %v206_v30, %v202_v31  ;;  %v208_v34 = vmul.f32 %v206_v30, %v203_v32  ;;  %v468_v32 = vmov 0.0  }
 0x143   :  { %v209_v35 = vmul.f32 1.442695, %v207_v33  ;;  %v211_v36 = vmul.f32 1.442695, %v208_v34 }
 0x145   :  { %370 = vpow2.f32 %v209_v35 }
 0x146   :  { %372 = vpow2.f32 %v211_v36 }
 0x14f   :  { %v371_v37 = vpop.eup %370 }
 0x150   :  { %v373_v38 = vpop.eup %372  ;;  %374 = vrsqrt.f32 %v371_v37  ;;  %vm215_vm2 = vcmp.eq.f32.partialorder %v371_v37, inf  ;;  %v218_v42 = vand.u32 2147483648, %v371_v37  ;;  %vm217_vm3 = vcmp.eq.f32.partialorder %v371_v37, 0.0 }
 0x151   :  { %376 = vrsqrt.f32 %v373_v38  ;;  %vm222_vm4 = vcmp.eq.f32.partialorder %v373_v38, inf  ;;  %v225_v45 = vand.u32 2147483648, %v373_v38  ;;  %vm224_vm5 = vcmp.eq.f32.partialorder %v373_v38, 0.0 }
 0x15a   :  { %v375_v39 = vpop.eup %374 }
 0x15b   :  { %v377_v40 = vpop.eup %376  ;;  %v214_v41 = vmul.f32 %v375_v39, %v371_v37 }
 0x15c   :  { %v221_v43 = vmul.f32 %v377_v40, %v373_v38 }
 0x15d   :  { %v216_v44 = vsel %vm215_vm2, %v371_v37, %v214_v41 }
 0x15e   :  { %v219_v46 = vsel %vm217_vm3, %v218_v42, %v216_v44  ;;  %v223_v47 = vsel %vm222_vm4, %v373_v38, %v221_v43  ;;  %vm295_vm3 = vmxor %vm291_vm14, %vm466_vm15 }
 0x15f   :  { %v226_v48 = vsel %vm224_vm5, %v225_v45, %v223_v47  ;;  %v227_v49 = vadd.f32 %v371_v37, %v219_v46  ;;  %378 = vrsqrt.f32 %v219_v46  ;;  %vm231_vm6 = vcmp.eq.f32.partialorder %v219_v46, inf }
 0x160   :  { %v228_v50 = vadd.f32 %v373_v38, %v226_v48  ;;  %380 = vrsqrt.f32 %v226_v48  ;;  %v234_v54 = vand.u32 2147483648, %v219_v46  ;;  %vm233_vm7 = vcmp.eq.f32.partialorder %v219_v46, 0.0 }
 0x161   :  { %vm238_vm8 = vcmp.eq.f32.partialorder %v226_v48, inf  ;;  %v241_v57 = vand.u32 2147483648, %v226_v48  ;;  %vm240_vm9 = vcmp.eq.f32.partialorder %v226_v48, 0.0  ;;  %v297_v25 = vsel %vm295_vm3, 1.0, %v467_v17 }
 0x169   :  { %v379_v51 = vpop.eup %378 }
 0x16a   :  { %v381_v52 = vpop.eup %380  ;;  %v230_v53 = vmul.f32 %v379_v51, %v219_v46 }
 0x16b   :  { %v237_v55 = vmul.f32 %v381_v52, %v226_v48 }
 0x16c   :  { %v232_v56 = vsel %vm231_vm6, %v219_v46, %v230_v53 }
 0x16d   :  { %v235_v58 = vsel %vm233_vm7, %v234_v54, %v232_v56  ;;  %v239_v59 = vsel %vm238_vm8, %v226_v48, %v237_v55  ;;  %vm301_vm7 = vcmask 130048   ;;  %vm50_vm8 = vcmask 0  }
 0x16e   :  { %v242_v60 = vsel %vm240_vm9, %v241_v57, %v239_v59  ;;  %v243_v61 = vadd.f32 %v235_v58, %v227_v49  ;;  %382 = vrsqrt.f32 %v235_v58  ;;  %vm247_vm10 = vcmp.eq.f32.partialorder %v235_v58, inf  ;;  %51 = vst.msk [vmem:[#allocation2] sm:$0x1] %vm50_vm8, %v468_v32 }
 0x16f   :  { %v244_v62 = vadd.f32 %v242_v60, %v228_v50  ;;  %384 = vrsqrt.f32 %v242_v60  ;;  %v250_v2 = vand.u32 2147483648, %v235_v58  ;;  %vm249_vm11 = vcmp.eq.f32.partialorder %v235_v58, 0.0 }
 0x170   :  { %vm254_vm12 = vcmp.eq.f32.partialorder %v242_v60, inf  ;;  %v257_v5 = vand.u32 2147483648, %v242_v60  ;;  %vm256_vm13 = vcmp.eq.f32.partialorder %v242_v60, 0.0 }
 0x175   :  { %v298_v40 = vld [vmem:[#allocation2] sm:$0x1] }
 0x178   :  { %v383_v63 = vpop.eup %382 }
 0x179   :  { %v385_v0 = vpop.eup %384  ;;  %v246_v1 = vmul.f32 %v383_v63, %v235_v58 }
 0x17a   :  { %v253_v3 = vmul.f32 %v385_v0, %v242_v60 }
 0x17b   :  { %v248_v4 = vsel %vm247_vm10, %v235_v58, %v246_v1 }
 0x17c   :  { %v251_v6 = vsel %vm249_vm11, %v250_v2, %v248_v4  ;;  %v255_v7 = vsel %vm254_vm12, %v242_v60, %v253_v3 }
 0x17d   :  { %v258_v8 = vsel %vm256_vm13, %v257_v5, %v255_v7  ;;  %v259_v9 = vadd.f32 %v251_v6, %v243_v61  ;;  %386 = vrsqrt.f32 %v251_v6  ;;  %vm263_vm2 = vcmp.eq.f32.partialorder %v251_v6, inf }
 0x17e   :  { %v260_v11 = vadd.f32 %v258_v8, %v244_v62  ;;  %388 = vrsqrt.f32 %v258_v8  ;;  %v266_v15 = vand.u32 2147483648, %v251_v6  ;;  %vm265_vm4 = vcmp.eq.f32.partialorder %v251_v6, 0.0 }
 0x17f   :  { %vm270_vm5 = vcmp.eq.f32.partialorder %v258_v8, inf  ;;  %v273_v19 = vand.u32 2147483648, %v258_v8  ;;  %vm272_vm6 = vcmp.eq.f32.partialorder %v258_v8, 0.0 }
 0x187   :  { %v387_v12 = vpop.eup %386 }
 0x188   :  { %v389_v13 = vpop.eup %388  ;;  %v262_v14 = vmul.f32 %v387_v12, %v251_v6 }
 0x189   :  { %v269_v16 = vmul.f32 %v389_v13, %v258_v8 }
 0x18a   :  { %v264_v18 = vsel %vm263_vm2, %v251_v6, %v262_v14 }
 0x18b   :  { %v267_v20 = vsel %vm265_vm4, %v266_v15, %v264_v18  ;;  %v271_v21 = vsel %vm270_vm5, %v258_v8, %v269_v16 }
 0x18c   :  { %v274_v23 = vsel %vm272_vm6, %v273_v19, %v271_v21  ;;  %v275_v24 = vadd.f32 %v267_v20, %v259_v9 }
 0x18d   :  { %v276_v26 = vadd.f32 %v274_v23, %v260_v11 }
 0x18e   :  { %v299_v27 = vmul.f32 %v296_v22, %v275_v24 }
 0x18f   :  { %v300_v28 = vmul.f32 %v297_v25, %v276_v26 }
 0x190   :  { %v302_v29 = vsel %vm301_vm7, %v299_v27, 0.0 }
 0x191   :  { %v303_v30 = vsel %vm301_vm7, %v300_v28, 0.0 }
 0x192   :  { %v304_v31 = vadd.f32 %v303_v30, %v302_v29 }
 0x194   :  { %305 = vadd.xlane.f32.xlu1 %v304_v31 }
 0x221   :  { %v306_v33 = vpop.xlane.xlu1 %305 }
 0x222   :  { %v307_v34 = vrot.slane %v306_v33, 4 }
 0x224   :  { %v308_v35 = vadd.f32 %v307_v34, %v306_v33 }
 0x226   :  { %v309_v36 = vrot.slane %v308_v35, 2 }
 0x228   :  { %v310_v37 = vadd.f32 %v309_v36, %v308_v35 }
 0x22a   :  { %v311_v38 = vrot.slane %v310_v37, 1 }
 0x22c   :  { %v312_v39 = vadd.f32 %v311_v38, %v310_v37 }
 0x22e   :  { %360 = vpush %v312_v39 }
 0x25f   :  { %s361_s0 = spop %360 }
 0x260   :  { %v314_v41 = vstv %s361_s0 }
 0x261   :  { %v315_v42 = vadd.f32 %v314_v41, %v298_v40 }
 0x263   :  { %317 = vst.msk [vmem:[#allocation2] sm:$0x1] %vm50_vm8, %v315_v42 }
 0x26a   :  { %v320_v43 = vld [vmem:[#allocation2] sm:$0x1] }
 0x26b   :  { %v321_v44 = vmul.f32 0.015625, %v320_v43 }
 0x26d   :  { %322 = vst.msk [vmem:[#allocation9] sm:$0x1] %vm50_vm8, %v321_v44 }
 0x26e   :  { %445 = shalt.err (!%p442_p6)
}
 0x26f   :  { %s446_s18 = scalar_lea.hbm %s545_s3, 16 }
 0x270   :  { %p447_p7 = scmp.ne.s32.totalorder %s545_s3, %s446_s18  ;;  %p450_p8 = scmp.lt.u32.totalorder %s446_s18, %s545_s3 }
 0x272   :  { %p452_p9 = pnand %p450_p8, %p447_p7 }
 0x274   :  { %455 = shalt.err (!%p452_p9)
}
 0x275   :  { %332 = dma.vmem_to_hbm [thread:$0]  %s330_s13, 16, %s545_s3, [#allocation6]  }
 0x276   :  { %460 = dma.done.wait [#allocation6], 16  }
 0x277   :  { %461 = vsyncadd [#allocation6], 4294967280 }
 0x278   :  { %336 = vsyncpa [#allocation5], 1 }
 0x279   :  { %337 = vsyncpa [#allocation8], 1 }
 0x27a   :  { %338 = vsyncpa [#allocation6], 1 }

</bundles_post_ra>
